<compile_context>
chip_gen: v7x
topology: tpu7x:2x2x1
jax: 0.10.0
libtpu: 0.0.40
codegen_flags: <defaults>
</compile_context>

<pallas_src>
import functools

import jax
import jax.numpy as jnp
from jax.experimental import pallas as pl
from jax.experimental.pallas import tpu as pltpu


def _mase_kernel(insample_ref, forecast_ref, target_ref, mask_ref, out_ref,
                 rowsum_ref, *, freq, batch, block_b, mask_rows):
    """One batch tile per grid step.

    insample_ref : (TB, T_i) VMEM
    forecast_ref : (TB, T_o) VMEM
    target_ref   : (TB, T_o) VMEM
    mask_ref     : (TB, T_o) VMEM
    out_ref      : (1, 1, 1) f32 VMEM  — per-chunk accumulator block (index depends only on c)
    rowsum_ref   : (TB, 1) f32 VMEM scratch — per-step lane-reduced partial sums
    """
    c = pl.program_id(0)           # chunk (maps to a TensorCore on v7x)
    i = pl.program_id(1)           # step within chunk (reduction axis)

    @pl.when(i == 0)
    def _init():
        rowsum_ref[...] = jnp.zeros_like(rowsum_ref)
        out_ref[...] = jnp.zeros_like(out_ref)

    insample = insample_ref[...].astype(jnp.float32)
    forecast = forecast_ref[...].astype(jnp.float32)
    target = target_ref[...].astype(jnp.float32)
    mask = mask_ref[...].astype(jnp.float32)

    # masep = mean_t |insample[:, t+freq] - insample[:, t]|  -> (TB, 1)
    n_lag = insample.shape[1] - freq
    diff = jnp.abs(insample[:, freq:] - insample[:, :-freq])        # (TB, T_i - freq)
    masep = jnp.sum(diff, axis=1, keepdims=True) * (1.0 / n_lag)    # (TB, 1)

    # divide_no_nan(mask, masep), per row.  masep >= 0, so the only non-finite outcomes of
    # 1/masep are +inf (masep == 0, or subnormal masep overflowing) — map those rows to 0,
    # exactly like the reference's NaN/+inf -> 0 post-selects.
    recip = pl.reciprocal(masep, approx=False)                       # (TB, 1)
    inv = jnp.where(recip < jnp.inf, recip, 0.0)                     # kills +inf and NaN

    contrib = jnp.abs(target - forecast) * mask * inv                # (TB, T_o)

    # Zero padded / out-of-range / duplicated (clamped) rows so the true mean over B*T_o
    # is preserved.  (jnp.where is a select, so garbage NaN/inf never propagate.)
    if mask_rows:
        row0 = (c * pl.num_programs(1) + i) * block_b
        row = jax.lax.broadcasted_iota(jnp.int32, contrib.shape, 0) + row0
        contrib = jnp.where(row < batch, contrib, 0.0)

    # Lane reduce only, per step; cross-sublane collapse deferred to finalize.
    rowsum_ref[...] += jnp.sum(contrib, axis=1, keepdims=True)       # (TB, 1)

    @pl.when(i == pl.num_programs(1) - 1)
    def _finalize():
        out_ref[...] = jnp.sum(rowsum_ref[...], keepdims=True).reshape(1, 1, 1)


def _round_up(x, m):
    return ((x + m - 1) // m) * m


def _choose_block_b(batch, t_in, t_out, dtypes):
    """Largest legal batch tile from a generation-aware, padding-aware VMEM budget.

    Returns (block_b, vmem_limit_bytes)."""
    itemsizes = [d.itemsize for d in dtypes]                 # insample, forecast, target, mask
    t_in_pad = _round_up(t_in, 128)
    t_out_pad = _round_up(t_out, 128)
    # Padded VMEM bytes per batch row for ONE pipeline buffer of all four inputs.
    per_row_in = (itemsizes[0] * t_in_pad
                  + (itemsizes[1] + itemsizes[2] + itemsizes[3]) * t_out_pad)
    # Headroom per row: a few live f32 elementwise temporaries + (TB,1) f32 scratch
    # (lane-padded to 128).
    per_row_tmp = 4 * 4 * max(t_in_pad, t_out_pad) + 4 * 128

    try:  # v5e/v6e: 128 MiB, v7x: 64 MiB per TensorCore
        vmem_cap = int(pltpu.get_tpu_info().vmem_capacity_bytes)
    except Exception:  # conservative fallback (v7x per-TC size)
        vmem_cap = 64 * 1024 * 1024
    vmem_limit = min((vmem_cap * 3) // 4, 96 * 1024 * 1024)
    budget = (vmem_limit * 7) // 10                           # leave compiler/spill headroom

    sub = max(32 // s for s in itemsizes)                     # sublane multiple: f32 8, bf16 16, i8 32
    sub = max(8, min(sub, 32))
    tb = budget // (2 * per_row_in + per_row_tmp)             # 2 pipeline buffers per input
    tb = min(max((tb // sub) * sub, sub), 16384)
    if tb >= batch:
        return batch, vmem_limit                              # single full-batch block (always legal)
    return tb, vmem_limit


def mase_loss_pallas(insample, freq, forecast, target, mask, *, block_b=None):
    """JAX wrapper.  `freq` must be a static Python int (as in the torch API)."""
    freq = int(freq)
    b, t_in = insample.shape
    b2, t_out = forecast.shape
    assert b == b2 and target.shape == (b, t_out) and mask.shape == (b, t_out)
    assert 0 < freq < t_in, "freq must satisfy 0 < freq < time_i"

    tb, vmem_limit = _choose_block_b(
        b, t_in, t_out, (insample.dtype, forecast.dtype, target.dtype, mask.dtype))
    if block_b is not None:                                   # test / tuning override
        tb = min(int(block_b), b)

    nb = pl.cdiv(b, tb)                                       # batch blocks
    nc = 2 if nb >= 2 else 1                                  # chunks (TensorCores on v7x)
    spc = pl.cdiv(nb, nc)                                     # steps per chunk
    covered = nc * spc * tb                                   # rows logically covered by grid
    mask_rows = covered != b

    kernel = functools.partial(
        _mase_kernel, freq=freq, batch=b, block_b=tb, mask_rows=mask_rows)

    def in_map(c, i, _spc=spc, _nb=nb):
        # Clamp so the (possibly padded) last chunk never DMAs past the array; the
        # duplicated block's contribution is zeroed by the in-kernel row mask.
        return (jnp.minimum(c * _spc + i, _nb - 1), 0)

    out = pl.pallas_call(
        kernel,
        out_shape=jax.ShapeDtypeStruct((nc, 1, 1), jnp.float32),
        grid=(nc, spc),
        in_specs=[
            pl.BlockSpec((tb, t_in), in_map),    # insample
            pl.BlockSpec((tb, t_out), in_map),   # forecast
            pl.BlockSpec((tb, t_out), in_map),   # target
            pl.BlockSpec((tb, t_out), in_map),   # mask
        ],
        out_specs=pl.BlockSpec((1, 1, 1), lambda c, i: (c, 0, 0)),
        scratch_shapes=[pltpu.VMEM((tb, 1), jnp.float32)],
        compiler_params=pltpu.CompilerParams(
            dimension_semantics=("parallel", "arbitrary"),
            vmem_limit_bytes=int(vmem_limit)),
    )(insample, forecast, target, mask)

    # Final cross-chunk sum + true mean over B*T_o done on the host side of the call.
    return jnp.sum(out) / (b * t_out)


def _mase_loss_ref(insample, freq, forecast, target, mask):
    """Pure-JAX reference mirroring the torch module exactly."""
    masep = jnp.mean(jnp.abs(insample[:, freq:] - insample[:, :-freq]), axis=1)
    r = mask / masep[:, None]
    r = jnp.where(r != r, 0.0, r)          # NaN (0/0) -> 0
    r = jnp.where(r == jnp.inf, 0.0, r)    # +inf (x/0) -> 0
    return jnp.mean(jnp.abs(target - forecast) * r)


if __name__ == "__main__":
    # --- Test 1: small shapes, single block, divide_no_nan path exercised ---
    B, T_I, T_O, FREQ = 4, 16, 8, 2
    key = jax.random.PRNGKey(0)
    k1, k2, k3, k4 = jax.random.split(key, 4)
    insample = jax.random.normal(k1, (B, T_I), dtype=jnp.float32)
    insample = insample.at[0].set(1.0)      # constant row -> masep == 0 -> divide_no_nan
    forecast = jax.random.normal(k2, (B, T_O), dtype=jnp.float32)
    target = jax.random.normal(k3, (B, T_O), dtype=jnp.float32)
    mask = (jax.random.uniform(k4, (B, T_O)) > 0.3).astype(jnp.float32)

    loss = mase_loss_pallas(insample, FREQ, forecast, target, mask)
    jax.block_until_ready(loss)
    ref = _mase_loss_ref(insample, FREQ, forecast, target, mask)
    assert jnp.allclose(loss, ref, rtol=1e-5, atol=1e-5), (loss, ref)

    # --- Test 2: forced small tiles -> multi-block grid, two chunks, partial / clamped
    #     blocks and the row mask all exercised ---
    B2, T_I2, T_O2, FREQ2 = 20, 48, 24, 7
    k5, k6, k7, k8 = jax.random.split(jax.random.PRNGKey(1), 4)
    insample2 = jax.random.normal(k5, (B2, T_I2), dtype=jnp.float32)
    insample2 = insample2.at[3].set(-2.5)   # another masep == 0 row
    forecast2 = jax.random.normal(k6, (B2, T_O2), dtype=jnp.float32)
    target2 = jax.random.normal(k7, (B2, T_O2), dtype=jnp.float32)
    mask2 = (jax.random.uniform(k8, (B2, T_O2)) > 0.5).astype(jnp.float32)

    loss2 = mase_loss_pallas(insample2, FREQ2, forecast2, target2, mask2, block_b=8)
    jax.block_until_ready(loss2)
    ref2 = _mase_loss_ref(insample2, FREQ2, forecast2, target2, mask2)
    assert jnp.allclose(loss2, ref2, rtol=1e-5, atol=1e-5), (loss2, ref2)

    print("KERNEL_OK")
</pallas_src>

<mosaic_0001>
module attributes {stable_mosaic.version = 11 : i64} {
  func.func @_mase_kernel(%arg0: i32, %arg1: i32, %arg2: memref<4x16xf32, #tpu.memory_space<vmem>>, %arg3: memref<4x8xf32, #tpu.memory_space<vmem>>, %arg4: memref<4x8xf32, #tpu.memory_space<vmem>>, %arg5: memref<4x8xf32, #tpu.memory_space<vmem>>, %arg6: memref<1x1x1xf32, #tpu.memory_space<vmem>>, %arg7: memref<4x1xf32, #tpu.memory_space<vmem>>) attributes {dimension_semantics = [#tpu.dimension_semantics<parallel>, #tpu.dimension_semantics<arbitrary>], iteration_bounds = array<i64: 1, 1>, scalar_prefetch = 0 : i64, scratch_operands = 1 : i64, tpu.core_type = #tpu.core_type<tc>, window_params = [{transform_indices = @transform_0, window_bounds = array<i64: 4, 16>}, {transform_indices = @transform_1, window_bounds = array<i64: 4, 8>}, {transform_indices = @transform_2, window_bounds = array<i64: 4, 8>}, {transform_indices = @transform_3, window_bounds = array<i64: 4, 8>}, {transform_indices = @transform_4, window_bounds = array<i64: 1, 1, 1>}]} {
    %c0_i32 = arith.constant 0 : i32
    %0 = arith.cmpi eq, %arg1, %c0_i32 : i32
    %1 = arith.extui %0 : i1 to i32
    %c0_i32_0 = arith.constant 0 : i32
    %2 = arith.cmpi ne, %1, %c0_i32_0 : i32
    scf.if %2 {
      %cst_18 = arith.constant 0.000000e+00 : f32
      %33 = vector.broadcast %cst_18 : f32 to vector<4x1xf32>
      %c0_19 = arith.constant 0 : index
      %c0_20 = arith.constant 0 : index
      %34 = vector.load %arg7[%c0_19, %c0_20] : memref<4x1xf32, #tpu.memory_space<vmem>>, vector<4x1xf32>
      tpu.vector_store %arg7[%c0_19, %c0_20], %33 {strides = array<i32>} : memref<4x1xf32, #tpu.memory_space<vmem>>, vector<4x1xf32>,
      %cst_21 = arith.constant 0.000000e+00 : f32
      %35 = vector.broadcast %cst_21 : f32 to vector<1x1x1xf32>
      %c0_22 = arith.constant 0 : index
      %c0_23 = arith.constant 0 : index
      %c0_24 = arith.constant 0 : index
      %36 = vector.load %arg6[%c0_22, %c0_23, %c0_24] : memref<1x1x1xf32, #tpu.memory_space<vmem>>, vector<1x1x1xf32>
      tpu.vector_store %arg6[%c0_22, %c0_23, %c0_24], %35 {strides = array<i32>} : memref<1x1x1xf32, #tpu.memory_space<vmem>>, vector<1x1x1xf32>,
    } else {
    }
    %c0 = arith.constant 0 : index
    %c0_1 = arith.constant 0 : index
    %3 = vector.load %arg2[%c0, %c0_1] : memref<4x16xf32, #tpu.memory_space<vmem>>, vector<4x16xf32>
    %c0_2 = arith.constant 0 : index
    %c0_3 = arith.constant 0 : index
    %4 = vector.load %arg3[%c0_2, %c0_3] : memref<4x8xf32, #tpu.memory_space<vmem>>, vector<4x8xf32>
    %c0_4 = arith.constant 0 : index
    %c0_5 = arith.constant 0 : index
    %5 = vector.load %arg4[%c0_4, %c0_5] : memref<4x8xf32, #tpu.memory_space<vmem>>, vector<4x8xf32>
    %c0_6 = arith.constant 0 : index
    %c0_7 = arith.constant 0 : index
    %6 = vector.load %arg5[%c0_6, %c0_7] : memref<4x8xf32, #tpu.memory_space<vmem>>, vector<4x8xf32>
    %7 = vector.extract_strided_slice %3 {offsets = [0, 2], sizes = [4, 14], strides = [1, 1]} : vector<4x16xf32> to vector<4x14xf32>
    %8 = vector.extract_strided_slice %3 {offsets = [0, 0], sizes = [4, 14], strides = [1, 1]} : vector<4x16xf32> to vector<4x14xf32>
    %9 = arith.subf %7, %8 : vector<4x14xf32>
    %10 = math.absf %9 : vector<4x14xf32>
    %cst = arith.constant dense<0.000000e+00> : vector<4xf32>
    %11 = vector.multi_reduction <add>, %10, %cst [1] : vector<4x14xf32> to vector<4xf32>
    %12 = vector.shape_cast %11 : vector<4xf32> to vector<4x1xf32>
    %cst_8 = arith.constant 0.0714285746 : f32
    %13 = vector.broadcast %cst_8 : f32 to vector<4x1xf32>
    %14 = arith.mulf %12, %13 : vector<4x1xf32>
    %15 = tpu.reciprocal %14 : vector<4x1xf32> -> vector<4x1xf32>
    %cst_9 = arith.constant 0x7F800000 : f32
    %16 = vector.broadcast %cst_9 : f32 to vector<4x1xf32>
    %17 = arith.cmpf olt, %15, %16 : vector<4x1xf32>
    %cst_10 = arith.constant 0.000000e+00 : f32
    %18 = vector.broadcast %cst_10 : f32 to vector<4x1xf32>
    %19 = arith.select %17, %15, %18 : vector<4x1xi1>, vector<4x1xf32>
    %20 = arith.subf %5, %4 : vector<4x8xf32>
    %21 = math.absf %20 : vector<4x8xf32>
    %22 = arith.mulf %21, %6 : vector<4x8xf32>
    %23 = vector.broadcast %19 : vector<4x1xf32> to vector<4x8xf32>
    %24 = arith.mulf %22, %23 : vector<4x8xf32>
    %c0_11 = arith.constant 0 : index
    %c0_12 = arith.constant 0 : index
    %25 = vector.load %arg7[%c0_11, %c0_12] : memref<4x1xf32, #tpu.memory_space<vmem>>, vector<4x1xf32>
    %cst_13 = arith.constant dense<0.000000e+00> : vector<4xf32>
    %26 = vector.multi_reduction <add>, %24, %cst_13 [1] : vector<4x8xf32> to vector<4xf32>
    %27 = vector.shape_cast %26 : vector<4xf32> to vector<4x1xf32>
    %28 = arith.addf %25, %27 : vector<4x1xf32>
    %c0_14 = arith.constant 0 : index
    %c0_15 = arith.constant 0 : index
    %29 = vector.load %arg7[%c0_14, %c0_15] : memref<4x1xf32, #tpu.memory_space<vmem>>, vector<4x1xf32>
    tpu.vector_store %arg7[%c0_14, %c0_15], %28 {strides = array<i32>} : memref<4x1xf32, #tpu.memory_space<vmem>>, vector<4x1xf32>,
    %c0_i32_16 = arith.constant 0 : i32
    %30 = arith.cmpi eq, %arg1, %c0_i32_16 : i32
    %31 = arith.extui %30 : i1 to i32
    %c0_i32_17 = arith.constant 0 : i32
    %32 = arith.cmpi ne, %31, %c0_i32_17 : i32
    scf.if %32 {
      %c0_18 = arith.constant 0 : index
      %c0_19 = arith.constant 0 : index
      %33 = vector.load %arg7[%c0_18, %c0_19] : memref<4x1xf32, #tpu.memory_space<vmem>>, vector<4x1xf32>
      %34 = vector.shape_cast %33 : vector<4x1xf32> to vector<1x4x1xf32>
      %cst_20 = arith.constant dense<0.000000e+00> : vector<1xf32>
      %35 = vector.multi_reduction <add>, %34, %cst_20 [1, 2] : vector<1x4x1xf32> to vector<1xf32>
      %36 = vector.shape_cast %35 : vector<1xf32> to vector<1x1x1xf32>
      %37 = vector.extract %36[0, 0, 0] : f32 from vector<1x1x1xf32>
      %38 = vector.broadcast %37 : f32 to vector<1x1xf32>
      %39 = vector.shape_cast %38 : vector<1x1xf32> to vector<1x1x1xf32>
      %c0_21 = arith.constant 0 : index
      %c0_22 = arith.constant 0 : index
      %c0_23 = arith.constant 0 : index
      %40 = vector.load %arg6[%c0_21, %c0_22, %c0_23] : memref<1x1x1xf32, #tpu.memory_space<vmem>>, vector<1x1x1xf32>
      tpu.vector_store %arg6[%c0_21, %c0_22, %c0_23], %39 {strides = array<i32>} : memref<1x1x1xf32, #tpu.memory_space<vmem>>, vector<1x1x1xf32>,
    } else {
    }
    return
  }
  func.func @transform_0(%arg0: i32, %arg1: i32) -> (i32, i32) {
    %c1_i32 = arith.constant 1 : i32
    %0 = arith.muli %arg0, %c1_i32 : i32
    %1 = arith.addi %0, %arg1 : i32
    %c0_i32 = arith.constant 0 : i32
    %2 = arith.minsi %1, %c0_i32 : i32
    %c0_i32_0 = arith.constant 0 : i32
    %c0_i32_1 = arith.constant 0 : i32
    return %2, %c0_i32_0 : i32, i32
  }
  func.func @transform_1(%arg0: i32, %arg1: i32) -> (i32, i32) {
    %c1_i32 = arith.constant 1 : i32
    %0 = arith.muli %arg0, %c1_i32 : i32
    %1 = arith.addi %0, %arg1 : i32
    %c0_i32 = arith.constant 0 : i32
    %2 = arith.minsi %1, %c0_i32 : i32
    %c0_i32_0 = arith.constant 0 : i32
    %c0_i32_1 = arith.constant 0 : i32
    return %2, %c0_i32_0 : i32, i32
  }
  func.func @transform_2(%arg0: i32, %arg1: i32) -> (i32, i32) {
    %c1_i32 = arith.constant 1 : i32
    %0 = arith.muli %arg0, %c1_i32 : i32
    %1 = arith.addi %0, %arg1 : i32
    %c0_i32 = arith.constant 0 : i32
    %2 = arith.minsi %1, %c0_i32 : i32
    %c0_i32_0 = arith.constant 0 : i32
    %c0_i32_1 = arith.constant 0 : i32
    return %2, %c0_i32_0 : i32, i32
  }
  func.func @transform_3(%arg0: i32, %arg1: i32) -> (i32, i32) {
    %c1_i32 = arith.constant 1 : i32
    %0 = arith.muli %arg0, %c1_i32 : i32
    %1 = arith.addi %0, %arg1 : i32
    %c0_i32 = arith.constant 0 : i32
    %2 = arith.minsi %1, %c0_i32 : i32
    %c0_i32_0 = arith.constant 0 : i32
    %c0_i32_1 = arith.constant 0 : i32
    return %2, %c0_i32_0 : i32, i32
  }
  func.func @transform_4(%arg0: i32, %arg1: i32) -> (i32, i32, i32) {
    %c0_i32 = arith.constant 0 : i32
    %c0_i32_0 = arith.constant 0 : i32
    %c0_i32_1 = arith.constant 0 : i32
    return %arg0, %c0_i32, %c0_i32_0 : i32, i32, i32
  }
}

</mosaic_0001>

<bundles_post_ra>
// kernel: tpu_custom_call.1
= control target key start
LH: loop header
LB: loop body
LE: loop exit
PB: predicated region body
PF: predicated region fallthrough
CT: control target
= control target key end

     0   :  { %9 = vsyncpa [#allocation4], 0  ;;  %s361_s0 = inlined_call_operand.hbm [shape: f32[4,16], index: 0, kind: input, shape index: {}]   ;;  %s362_s1 = inlined_call_operand.hbm [shape: f32[4,8], index: 1, kind: input, shape index: {}]   ;;  %s363_s2 = inlined_call_operand.vmem [shape: f32[4,8], index: 2, kind: input, shape index: {}]   ;;  %s364_s3 = inlined_call_operand.vmem [shape: f32[4,8], index: 3, kind: input, shape index: {}]   ;;  %s365_s4 = inlined_call_operand.hbm [shape: f32[1,1,1], index: 4, kind: output, shape index: {}]  }
   0x1   :  { %10 = vsyncpa [#allocation7], 0 }
   0x2   :  { %11 = vsyncpa [#allocation5], 0  ;;  %s285_s15 = smov [#allocation3]   ;;  %s286_s17 = smov [#allocation6]  }
   0x3   :  { %s23_s16 = sshll.u32 %s285_s15, 4  ;;  %s38_s18 = sshll.u32 %s286_s17, 4  ;;  %s24_s16 = int_to_ptr.vmem [resolvable:$true] %s23_s16  ;;  %s39_s18 = int_to_ptr.vmem [resolvable:$true] %s38_s18 }
   0x4   :  { %s213_s21 = scalar_lea.hbm %s361_s0, 64 }
   0x5   :  { %p214_p0 = scmp.ne.s32.totalorder %s361_s0, %s213_s21  ;;  %p217_p1 = scmp.lt.u32.totalorder %s213_s21, %s361_s0 }
   0x7   :  { %p219_p2 = pnand %p217_p1, %p214_p0 }
   0x9   :  { %222 = shalt.err (!%p219_p2)
}
   0xa   :  { %s223_s26 = scalar_lea.vmem %s24_s16, 64  ;;  %p228_p4 = scmp.lt.s32.totalorder %s24_s16, %s24_s16 }
   0xb   :  { %p224_p3 = scmp.ne.s32.totalorder %s24_s16, %s223_s26  ;;  %p229_p5 = scmp.lt.s32.totalorder %s223_s26, %s223_s26 }
   0xd   :  { %p230_p6 = por %p229_p5, %p228_p4 }
   0xf   :  { %p231_p7 = pnand %p230_p6, %p224_p3 }
  0x11   :  { %234 = shalt.err (!%p231_p7)
}
  0x12   :  { %26 = dma.hbm_to_vmem [thread:$0]  %s361_s0, 64, %s24_s16, [#allocation4]  }
  0x13   :  { %s235_s5 = scalar_lea.hbm %s362_s1, 64 }
  0x14   :  { %p236_p8 = scmp.ne.s32.totalorder %s362_s1, %s235_s5  ;;  %p239_p9 = scmp.lt.u32.totalorder %s235_s5, %s362_s1 }
  0x16   :  { %p241_p10 = pnand %p239_p9, %p236_p8 }
  0x18   :  { %244 = shalt.err (!%p241_p10)
}
  0x19   :  { %s245_s10 = scalar_lea.vmem %s39_s18, 64  ;;  %p250_p12 = scmp.lt.s32.totalorder %s39_s18, %s39_s18 }
  0x1a   :  { %p246_p11 = scmp.ne.s32.totalorder %s39_s18, %s245_s10  ;;  %p251_p13 = scmp.lt.s32.totalorder %s245_s10, %s245_s10 }
  0x1c   :  { %p252_p0 = por %p251_p13, %p250_p12 }
  0x1e   :  { %p253_p1 = pnand %p252_p0, %p246_p11 }
  0x20   :  { %256 = shalt.err (!%p253_p1)
}
  0x21   :  { %41 = dma.hbm_to_vmem [thread:$0]  %s362_s1, 64, %s39_s18, [#allocation7]  }
  0x22   :  { %279 = dma.done.wait [#allocation4], 64  }
  0x23   :  { %280 = vsyncadd [#allocation4], 4294967232 }
  0x24   :  { %281 = dma.done.wait [#allocation7], 64  }
  0x25   :  { %282 = vsyncadd [#allocation7], 4294967232  ;;  %v120_v0 = vld [vmem:[#allocation3] sm:$0xf]  ;;  %s287_s12 = smov 2   ;;  %s288_s13 = smov 126  }
  0x26   :  { %125 = vrot.lane.b32.xlu0 %v120_v0, %s287_s12  ;;  %vm134_vm0 = vcmask 109568   ;;  %vm116_vm1 = vcmask 3072   ;;  %v289_v6 = vmov 0.0   ;;  %v121_v9 = vld [vmem:[#allocation6] sm:$0xf]  ;;  %vm147_vm3 = vcmask 60416  }
  0x27   :  { %117 = vst.msk [vmem:[#allocation2] sm:$0xf] %vm116_vm1, %v289_v6  ;;  %v122_v10 = vld [vmem:[%s363_s2] sm:$0xf]  ;;  %vm118_vm4 = vcmask 0   ;;  %s290_s2 = smov [#allocation8]  }
  0x28   :  { %v142_v11 = vsub.f32 %v122_v10, %v121_v9  ;;  %v123_v13 = vld [vmem:[%s364_s3] sm:$0xf]  ;;  %119 = vst.msk [vmem:[#allocation8] sm:$0x1] %vm118_vm4, %v289_v6  ;;  %s177_s3 = sshll.u32 %s290_s2, 4  ;;  %s178_s3 = int_to_ptr.vmem [resolvable:$true] %s177_s3 }
  0x29   :  { %s257_s18 = scalar_lea.vmem %s178_s3, 16  ;;  %s261_s19 = scalar_lea.vmem %s178_s3, 32 }
  0x2a   :  { %v143_v12 = vand.u32 2147483647, %v142_v11  ;;  %p258_p2 = scmp.ne.s32.totalorder %s178_s3, %s257_s18  ;;  %p262_p3 = scmp.lt.s32.totalorder %s178_s3, %s178_s3 }
  0x2b   :  { %p263_p4 = scmp.lt.s32.totalorder %s261_s19, %s257_s18 }
  0x2c   :  { %v144_v14 = vmul.f32 %v143_v12, %v123_v13 }
  0x2d   :  { %p264_p5 = por %p263_p4, %p262_p3 }
  0x2e   :  { %v146_v19 = vld [vmem:[#allocation2] sm:$0xf] }
  0x2f   :  { %p265_p6 = pnand %p264_p5, %p258_p2 }
  0x98   :  { %v126_v1 = vpop.permute.xlu0 %125 }
  0x99   :  { %v128_v2 = vsub.f32 %v120_v0, %v126_v1 }
  0x9b   :  { %v129_v3 = vand.u32 2147483647, %v128_v2 }
  0x9d   :  { %131 = vrot.lane.b32.xlu0 %v129_v3, %s288_s13 }
 0x10f   :  { %v132_v4 = vpop.permute.xlu0 %131 }
 0x110   :  { %v135_v5 = vsel %vm134_vm0, %v132_v4, 0.0 }
 0x111   :  { %136 = vadd.xlane.f32.xlu1 %v135_v5 }
 0x19e   :  { %v137_v7 = vpop.xlane.xlu1 %136 }
 0x19f   :  { %v138_v8 = vmul.f32 0.071428575, %v137_v7 }
 0x1a1   :  { %211 = vrcp.f32 %v138_v8 }
 0x1ab   :  { %v212_v15 = vpop.eup %211 }
 0x1ac   :  { %vm140_vm2 = vcmp.lt.f32.partialorder %v212_v15, inf }
 0x1ad   :  { %v141_v16 = vsel %vm140_vm2, %v212_v15, 0.0 }
 0x1ae   :  { %v145_v17 = vmul.f32 %v144_v14, %v141_v16 }
 0x1b0   :  { %v148_v18 = vsel %vm147_vm3, %v145_v17, 0.0 }
 0x1b1   :  { %149 = vadd.xlane.f32.xlu1 %v148_v18 }
 0x23e   :  { %v150_v20 = vpop.xlane.xlu1 %149 }
 0x23f   :  { %v151_v21 = vadd.f32 %v150_v20, %v146_v19 }
 0x241   :  { %153 = vst.msk [vmem:[#allocation2] sm:$0xf] %vm116_vm1, %v151_v21 }
 0x248   :  { %v157_v22 = vld [vmem:[#allocation2] sm:$0xf] }
 0x249   :  { %v158_v23 = vsel %vm116_vm1, %v157_v22, 0.0 }
 0x24a   :  { %159 = vadd.xlane.f32.xlu0 %v158_v23 }
 0x2d7   :  { %v160_v24 = vpop.xlane.xlu0 %159 }
 0x2d8   :  { %v161_v25 = vrot.slane %v160_v24, 4 }
 0x2da   :  { %v162_v26 = vadd.f32 %v161_v25, %v160_v24 }
 0x2dc   :  { %v163_v27 = vrot.slane %v162_v26, 2 }
 0x2de   :  { %v164_v28 = vadd.f32 %v163_v27, %v162_v26 }
 0x2e0   :  { %v165_v29 = vrot.slane %v164_v28, 1 }
 0x2e2   :  { %v166_v30 = vadd.f32 %v165_v29, %v164_v28 }
 0x2e4   :  { %203 = vpush %v166_v30 }
 0x315   :  { %s204_s17 = spop %203 }
 0x316   :  { %v168_v31 = vstv %s204_s17 }
 0x317   :  { %170 = vst.msk [vmem:[#allocation8] sm:$0x1] %vm118_vm4, %v168_v31 }
 0x318   :  { %268 = shalt.err (!%p265_p6)
}
 0x319   :  { %s269_s22 = scalar_lea.hbm %s365_s4, 16 }
 0x31a   :  { %p270_p7 = scmp.ne.s32.totalorder %s365_s4, %s269_s22  ;;  %p273_p8 = scmp.lt.u32.totalorder %s269_s22, %s365_s4 }
 0x31c   :  { %p275_p9 = pnand %p273_p8, %p270_p7 }
 0x31e   :  { %278 = shalt.err (!%p275_p9)
}
 0x31f   :  { %180 = dma.vmem_to_hbm [thread:$0]  %s178_s3, 16, %s365_s4, [#allocation5]  }
 0x320   :  { %283 = dma.done.wait [#allocation5], 16  }
 0x321   :  { %284 = vsyncadd [#allocation5], 4294967280 }
 0x322   :  { %184 = vsyncpa [#allocation4], 1 }
 0x323   :  { %185 = vsyncpa [#allocation7], 1 }
 0x324   :  { %186 = vsyncpa [#allocation5], 1 }

</bundles_post_ra>
